<compile_context>
chip_gen: v7x
topology: tpu7x:2x2x1
jax: 0.10.0
libtpu: 0.0.40
codegen_flags: <defaults>
</compile_context>

<pallas_src>
import functools

import jax
import jax.numpy as jnp
from jax.experimental import pallas as pl
from jax.experimental.pallas import tpu as pltpu


# ----------------------------------------------------------------------------
# Fused training kernel.  Grid = (phase, row_tile), both "arbitrary".
#   phase 0: accumulate shifted sum / sum-of-squares over batch tiles; on the
#            last tile fold the `pack` lane groups (lane rotations on the XLU),
#            compute mean / unbiased var, scale / offset, ladj row and the
#            updated running stats.
#   phase 1: y = x * scale + offset   (pure VPU, streams the same x tiles)
# ----------------------------------------------------------------------------
def _bn_train_kernel(x_ref, lg_ref, beta_ref, rmean_ref, rvar_ref,     # inputs
                     y_ref, ladj_ref, nrm_ref, nrv_ref,                # outputs
                     sum_ref, ssq_ref, shift0_ref, scale_ref, off_ref, # scratch
                     *, n_total_rows, n_packed_rows, tile_rows, pack, feat,
                     momentum, eps):
    phase = pl.program_id(0)
    t = pl.program_id(1)
    nt = pl.num_programs(1)

    @pl.when(phase == 0)
    def _phase0():
        @pl.when(t == 0)
        def _init():
            sum_ref[...] = jnp.zeros_like(sum_ref)
            ssq_ref[...] = jnp.zeros_like(ssq_ref)
            # per-lane shift (first packed row) for numerically-stable variance
            shift0_ref[...] = x_ref[0:1, :]

        x = x_ref[...]                                           # (tile_rows, L)
        # mask rows past the true packed batch (ragged last tile)
        rows = jax.lax.broadcasted_iota(jnp.int32, x.shape, 0) + t * tile_rows
        d = jnp.where(rows < n_packed_rows, x - shift0_ref[...], 0.0)
        sum_ref[...] += jnp.sum(d, axis=0, keepdims=True)        # Σ (x - s)
        ssq_ref[...] += jnp.sum(d * d, axis=0, keepdims=True)    # Σ (x - s)^2

        @pl.when(t == nt - 1)
        def _finalize():
            n = jnp.float32(n_total_rows)
            n_g = jnp.float32(n_packed_rows)        # rows seen per lane group
            s = shift0_ref[...]
            sx = sum_ref[...]
            sxx = ssq_ref[...]

            # Each of the `pack` lane groups holds a disjoint subset of the
            # batch.  Fold them with circular lane rotations: every lane ends
            # up holding the global per-feature statistic, already tiled for
            # the apply phase (no reshape / un-tile needed).
            sum_x = sx + n_g * s                    # per-group Σ x
            total_sum = sum_x
            for g in range(1, pack):
                total_sum = total_sum + pltpu.roll(sum_x, g * feat, axis=1)
            mean = total_sum / n

            dsm = s - mean
            css = sxx + 2.0 * dsm * sx + n_g * dsm * dsm   # per-group Σ (x-mean)^2
            total_css = css
            for g in range(1, pack):
                total_css = total_css + pltpu.roll(css, g * feat, axis=1)
            var = total_css / (n - 1.0)             # unbiased, matches torch.var(0)

            log_gamma = lg_ref[...]
            inv_std = jax.lax.rsqrt(var + eps)
            scale = jnp.exp(log_gamma) * inv_std
            scale_ref[...] = scale
            off_ref[...] = beta_ref[...] - mean * scale
            ladj_ref[...] = log_gamma - 0.5 * jnp.log(var + eps)
            nrm_ref[...] = momentum * rmean_ref[...] + (1.0 - momentum) * mean
            nrv_ref[...] = momentum * rvar_ref[...] + (1.0 - momentum) * var

    @pl.when(phase == 1)
    def _phase1():
        y_ref[...] = x_ref[...] * scale_ref[...] + off_ref[...]


# ----------------------------------------------------------------------------
# Eval-mode apply kernel (stats come from running buffers; O(D) param math is
# done in the wrapper, the O(N*D) normalize stays in Pallas, batch-parallel).
# ----------------------------------------------------------------------------
def _bn_apply_kernel(x_ref, scale_ref, off_ref, y_ref):
    y_ref[...] = x_ref[...] * scale_ref[...] + off_ref[...]


# ----------------------------------------------------------------------------
# Wrapper.  Returns (y, log_abs_det_jacobian, new_running_mean, new_running_var).
# ----------------------------------------------------------------------------
def batchnorm_forward(x, log_gamma, beta, running_mean, running_var,
                      *, momentum=0.9, eps=1e-5, training=True,
                      target_tile_rows=1024):
    x = jnp.asarray(x, jnp.float32)
    N, D = x.shape

    # Lane-dense packing: fold `pack` consecutive batch rows into the 128-lane
    # dim (free reshape of a contiguous array) instead of zero-padding D.
    if D < 128 and 128 % D == 0 and N % (128 // D) == 0:
        pack = 128 // D
    else:
        pack = 1          # fall back to full-dim (possibly narrow) blocks
    L = D * pack
    Np = N // pack
    xp = x.reshape(Np, L)

    if Np <= target_tile_rows:
        tile_rows = Np                         # whole x in one VMEM-resident tile
    else:
        tile_rows = max(8, (target_tile_rows // 8) * 8)
    grid_tiles = -(-Np // tile_rows)

    def tile_param(p):                          # (D,) -> (1, L) across lane groups
        return jnp.tile(jnp.asarray(p, jnp.float32).reshape(1, D), (1, pack))

    lg = tile_param(log_gamma)
    bt = tile_param(beta)
    rm = tile_param(running_mean)
    rv = tile_param(running_var)

    row_spec = pl.BlockSpec((1, L), lambda *_: (0, 0))     # VMEM-resident rows
    row_sds = jax.ShapeDtypeStruct((1, L), jnp.float32)

    # VMEM budget from the actual working set: double-buffered x and y tiles
    # plus a handful of (1, L) rows, with margin.  Tiny vs. any generation's VMEM.
    tile_bytes = tile_rows * L * 4
    vmem_bytes = int(max(4 * tile_bytes + 64 * L * 4 + (1 << 20), 4 << 20))

    if training:
        x_spec = pl.BlockSpec((tile_rows, L), lambda p, t: (t, 0))
        # phase 0 parks the y block at index 0 (never written -> single flush of
        # correct data after phase 1); phase 1 walks the tiles.
        y_spec = pl.BlockSpec((tile_rows, L), lambda p, t: (p * t, 0))
        kernel = functools.partial(
            _bn_train_kernel,
            n_total_rows=N, n_packed_rows=Np, tile_rows=tile_rows,
            pack=pack, feat=D, momentum=float(momentum), eps=float(eps))
        y, ladj_row, nrm, nrv = pl.pallas_call(
            kernel,
            grid=(2, grid_tiles),
            in_specs=[x_spec, row_spec, row_spec, row_spec, row_spec],
            out_specs=(y_spec, row_spec, row_spec, row_spec),
            out_shape=(jax.ShapeDtypeStruct((Np, L), jnp.float32),
                       row_sds, row_sds, row_sds),
            scratch_shapes=[pltpu.VMEM((1, L), jnp.float32)] * 5,
            compiler_params=pltpu.CompilerParams(
                # phase axis + batch reduction must run in order on one core
                dimension_semantics=("arbitrary", "arbitrary"),
                vmem_limit_bytes=vmem_bytes),
        )(xp, lg, bt, rm, rv)
    else:
        inv_std = jax.lax.rsqrt(rv + eps)
        scale = jnp.exp(lg) * inv_std
        offset = bt - rm * scale
        ladj_row = lg - 0.5 * jnp.log(rv + eps)
        nrm, nrv = rm, rv
        x_spec = pl.BlockSpec((tile_rows, L), lambda t: (t, 0))
        y = pl.pallas_call(
            _bn_apply_kernel,
            grid=(grid_tiles,),
            in_specs=[x_spec, row_spec, row_spec],
            out_specs=x_spec,
            out_shape=jax.ShapeDtypeStruct((Np, L), jnp.float32),
            compiler_params=pltpu.CompilerParams(
                dimension_semantics=("parallel",),
                vmem_limit_bytes=vmem_bytes),
        )(xp, scale, offset)

    y = y.reshape(N, D)                                    # free un-pack
    # torch returns log_abs_det_jacobian.expand_as(x) (a broadcast view).
    ladj = jnp.broadcast_to(ladj_row[0, :D], (N, D))
    # TODO(synk): torch mutates running_mean/running_var buffers in place; the
    # updated buffers are returned functionally instead.
    return y, ladj, nrm[0, :D], nrv[0, :D]


# ----------------------------------------------------------------------------
def _reference(x, log_gamma, beta, rm, rv, momentum, eps, training):
    if training:
        mean = x.mean(axis=0)
        var = jnp.var(x, axis=0, ddof=1)
        new_rm = momentum * rm + (1.0 - momentum) * mean
        new_rv = momentum * rv + (1.0 - momentum) * var
    else:
        mean, var, new_rm, new_rv = rm, rv, rm, rv
    y = jnp.exp(log_gamma) * (x - mean) / jnp.sqrt(var + eps) + beta
    ladj = jnp.broadcast_to(log_gamma - 0.5 * jnp.log(var + eps), x.shape)
    return y, ladj, new_rm, new_rv


if __name__ == "__main__":
    momentum, eps = 0.9, 1e-5
    key = jax.random.PRNGKey(0)
    kx, kg, kb, kx2 = jax.random.split(key, 4)

    # small flow config: batch=256, input_size=32 (+ nonzero mean to exercise
    # the shifted variance accumulation)
    N, D = 256, 32
    x = jax.random.normal(kx, (N, D), jnp.float32) * 2.0 + 3.0
    log_gamma = 0.1 * jax.random.normal(kg, (D,), jnp.float32)
    beta = 0.1 * jax.random.normal(kb, (D,), jnp.float32)
    running_mean = jnp.zeros((D,), jnp.float32)
    running_var = jnp.ones((D,), jnp.float32)

    # ---- training-mode forward (single fused kernel, x VMEM-resident) -------
    y, ladj, nrm, nrv = batchnorm_forward(
        x, log_gamma, beta, running_mean, running_var,
        momentum=momentum, eps=eps, training=True)
    jax.block_until_ready((y, ladj, nrm, nrv))
    y_r, ladj_r, rm_r, rv_r = _reference(
        x, log_gamma, beta, running_mean, running_var, momentum, eps, True)
    assert jnp.allclose(y, y_r, atol=1e-4, rtol=1e-4)
    assert jnp.allclose(ladj, ladj_r, atol=1e-5, rtol=1e-5)
    assert jnp.allclose(nrm, rm_r, atol=1e-5, rtol=1e-5)
    assert jnp.allclose(nrv, rv_r, atol=1e-4, rtol=1e-4)

    # ---- eval-mode forward (uses running buffers) ----------------------------
    y_e, ladj_e, _, _ = batchnorm_forward(
        x, log_gamma, beta, running_mean, running_var,
        momentum=momentum, eps=eps, training=False)
    jax.block_until_ready((y_e, ladj_e))
    ye_r, ladje_r, _, _ = _reference(
        x, log_gamma, beta, running_mean, running_var, momentum, eps, False)
    assert jnp.allclose(y_e, ye_r, atol=1e-5, rtol=1e-5)
    assert jnp.allclose(ladj_e, ladje_r, atol=1e-5, rtol=1e-5)

    # ---- multi-tile / ragged-last-tile training path (streamed pipeline) ----
    N2 = 1000
    x2 = jax.random.normal(kx2, (N2, D), jnp.float32) * 0.5 - 1.0
    y2, ladj2, nrm2, nrv2 = batchnorm_forward(
        x2, log_gamma, beta, running_mean, running_var,
        momentum=momentum, eps=eps, training=True, target_tile_rows=64)
    jax.block_until_ready((y2, ladj2, nrm2, nrv2))
    y2_r, ladj2_r, rm2_r, rv2_r = _reference(
        x2, log_gamma, beta, running_mean, running_var, momentum, eps, True)
    assert jnp.allclose(y2, y2_r, atol=1e-4, rtol=1e-4)
    assert jnp.allclose(ladj2, ladj2_r, atol=1e-5, rtol=1e-5)
    assert jnp.allclose(nrm2, rm2_r, atol=1e-5, rtol=1e-5)
    assert jnp.allclose(nrv2, rv2_r, atol=1e-4, rtol=1e-4)

    print("KERNEL_OK")
</pallas_src>

<mosaic_0001>
module attributes {stable_mosaic.version = 11 : i64} {
  func.func @_bn_train_kernel(%arg0: i32, %arg1: i32, %arg2: memref<64x128xf32, #tpu.memory_space<vmem>>, %arg3: memref<1x128xf32, #tpu.memory_space<vmem>>, %arg4: memref<1x128xf32, #tpu.memory_space<vmem>>, %arg5: memref<1x128xf32, #tpu.memory_space<vmem>>, %arg6: memref<1x128xf32, #tpu.memory_space<vmem>>, %arg7: memref<64x128xf32, #tpu.memory_space<vmem>>, %arg8: memref<1x128xf32, #tpu.memory_space<vmem>>, %arg9: memref<1x128xf32, #tpu.memory_space<vmem>>, %arg10: memref<1x128xf32, #tpu.memory_space<vmem>>, %arg11: memref<1x128xf32, #tpu.memory_space<vmem>>, %arg12: memref<1x128xf32, #tpu.memory_space<vmem>>, %arg13: memref<1x128xf32, #tpu.memory_space<vmem>>, %arg14: memref<1x128xf32, #tpu.memory_space<vmem>>, %arg15: memref<1x128xf32, #tpu.memory_space<vmem>>) attributes {dimension_semantics = [#tpu.dimension_semantics<arbitrary>, #tpu.dimension_semantics<arbitrary>], iteration_bounds = array<i64: 2, 1>, scalar_prefetch = 0 : i64, scratch_operands = 5 : i64, tpu.core_type = #tpu.core_type<tc>, window_params = [{transform_indices = @transform_0, window_bounds = array<i64: 64, 128>}, {pipeline_mode = #tpu.pipeline_mode<synchronous>, transform_indices = @transform_1, window_bounds = array<i64: 1, 128>}, {pipeline_mode = #tpu.pipeline_mode<synchronous>, transform_indices = @transform_2, window_bounds = array<i64: 1, 128>}, {pipeline_mode = #tpu.pipeline_mode<synchronous>, transform_indices = @transform_3, window_bounds = array<i64: 1, 128>}, {pipeline_mode = #tpu.pipeline_mode<synchronous>, transform_indices = @transform_4, window_bounds = array<i64: 1, 128>}, {transform_indices = @transform_5, window_bounds = array<i64: 64, 128>}, {pipeline_mode = #tpu.pipeline_mode<synchronous>, transform_indices = @transform_6, window_bounds = array<i64: 1, 128>}, {pipeline_mode = #tpu.pipeline_mode<synchronous>, transform_indices = @transform_7, window_bounds = array<i64: 1, 128>}, {pipeline_mode = #tpu.pipeline_mode<synchronous>, transform_indices = @transform_8, window_bounds = array<i64: 1, 128>}]} {
    %c0_i32 = arith.constant 0 : i32
    %0 = arith.cmpi eq, %arg0, %c0_i32 : i32
    %1 = arith.extui %0 : i1 to i32
    %c0_i32_0 = arith.constant 0 : i32
    %2 = arith.cmpi ne, %1, %c0_i32_0 : i32
    scf.if %2 {
      %c0_i32_2 = arith.constant 0 : i32
      %6 = arith.cmpi eq, %arg1, %c0_i32_2 : i32
      %7 = arith.extui %6 : i1 to i32
      %c0_i32_3 = arith.constant 0 : i32
      %8 = arith.cmpi ne, %7, %c0_i32_3 : i32
      scf.if %8 {
        %cst_20 = arith.constant 0.000000e+00 : f32
        %35 = vector.broadcast %cst_20 : f32 to vector<1x128xf32>
        %c0_21 = arith.constant 0 : index
        %c0_22 = arith.constant 0 : index
        %36 = vector.load %arg11[%c0_21, %c0_22] : memref<1x128xf32, #tpu.memory_space<vmem>>, vector<1x128xf32>
        tpu.vector_store %arg11[%c0_21, %c0_22], %35 {strides = array<i32>} : memref<1x128xf32, #tpu.memory_space<vmem>>, vector<1x128xf32>,
        %cst_23 = arith.constant 0.000000e+00 : f32
        %37 = vector.broadcast %cst_23 : f32 to vector<1x128xf32>
        %c0_24 = arith.constant 0 : index
        %c0_25 = arith.constant 0 : index
        %38 = vector.load %arg12[%c0_24, %c0_25] : memref<1x128xf32, #tpu.memory_space<vmem>>, vector<1x128xf32>
        tpu.vector_store %arg12[%c0_24, %c0_25], %37 {strides = array<i32>} : memref<1x128xf32, #tpu.memory_space<vmem>>, vector<1x128xf32>,
        %c0_26 = arith.constant 0 : index
        %c0_27 = arith.constant 0 : index
        %39 = vector.load %arg2[%c0_26, %c0_27] : memref<64x128xf32, #tpu.memory_space<vmem>>, vector<1x128xf32>
        %c0_28 = arith.constant 0 : index
        %c0_29 = arith.constant 0 : index
        %40 = vector.load %arg13[%c0_28, %c0_29] : memref<1x128xf32, #tpu.memory_space<vmem>>, vector<1x128xf32>
        tpu.vector_store %arg13[%c0_28, %c0_29], %39 {strides = array<i32>} : memref<1x128xf32, #tpu.memory_space<vmem>>, vector<1x128xf32>,
      } else {
      }
      %c0 = arith.constant 0 : index
      %c0_4 = arith.constant 0 : index
      %9 = vector.load %arg2[%c0, %c0_4] : memref<64x128xf32, #tpu.memory_space<vmem>>, vector<64x128xf32>
      %10 = tpu.iota {dimensions = array<i32: 0>} : vector<64x128xi32>
      %c64_i32 = arith.constant 64 : i32
      %11 = arith.muli %arg1, %c64_i32 : i32
      %12 = vector.broadcast %11 : i32 to vector<64x128xi32>
      %13 = arith.addi %10, %12 : vector<64x128xi32>
      %c64_i32_5 = arith.constant 64 : i32
      %14 = vector.broadcast %c64_i32_5 : i32 to vector<64x128xi32>
      %15 = arith.cmpi slt, %13, %14 : vector<64x128xi32>
      %c0_6 = arith.constant 0 : index
      %c0_7 = arith.constant 0 : index
      %16 = vector.load %arg13[%c0_6, %c0_7] : memref<1x128xf32, #tpu.memory_space<vmem>>, vector<1x128xf32>
      %17 = vector.broadcast %16 : vector<1x128xf32> to vector<64x128xf32>
      %18 = arith.subf %9, %17 : vector<64x128xf32>
      %cst = arith.constant 0.000000e+00 : f32
      %19 = vector.broadcast %cst : f32 to vector<64x128xf32>
      %20 = arith.select %15, %18, %19 : vector<64x128xi1>, vector<64x128xf32>
      %c0_8 = arith.constant 0 : index
      %c0_9 = arith.constant 0 : index
      %21 = vector.load %arg11[%c0_8, %c0_9] : memref<1x128xf32, #tpu.memory_space<vmem>>, vector<1x128xf32>
      %cst_10 = arith.constant dense<0.000000e+00> : vector<128xf32>
      %22 = vector.multi_reduction <add>, %20, %cst_10 [0] : vector<64x128xf32> to vector<128xf32>
      %23 = vector.shape_cast %22 : vector<128xf32> to vector<1x128xf32>
      %24 = arith.addf %21, %23 : vector<1x128xf32>
      %c0_11 = arith.constant 0 : index
      %c0_12 = arith.constant 0 : index
      %25 = vector.load %arg11[%c0_11, %c0_12] : memref<1x128xf32, #tpu.memory_space<vmem>>, vector<1x128xf32>
      tpu.vector_store %arg11[%c0_11, %c0_12], %24 {strides = array<i32>} : memref<1x128xf32, #tpu.memory_space<vmem>>, vector<1x128xf32>,
      %c0_13 = arith.constant 0 : index
      %c0_14 = arith.constant 0 : index
      %26 = vector.load %arg12[%c0_13, %c0_14] : memref<1x128xf32, #tpu.memory_space<vmem>>, vector<1x128xf32>
      %27 = arith.mulf %20, %20 : vector<64x128xf32>
      %cst_15 = arith.constant dense<0.000000e+00> : vector<128xf32>
      %28 = vector.multi_reduction <add>, %27, %cst_15 [0] : vector<64x128xf32> to vector<128xf32>
      %29 = vector.shape_cast %28 : vector<128xf32> to vector<1x128xf32>
      %30 = arith.addf %26, %29 : vector<1x128xf32>
      %c0_16 = arith.constant 0 : index
      %c0_17 = arith.constant 0 : index
      %31 = vector.load %arg12[%c0_16, %c0_17] : memref<1x128xf32, #tpu.memory_space<vmem>>, vector<1x128xf32>
      tpu.vector_store %arg12[%c0_16, %c0_17], %30 {strides = array<i32>} : memref<1x128xf32, #tpu.memory_space<vmem>>, vector<1x128xf32>,
      %c0_i32_18 = arith.constant 0 : i32
      %32 = arith.cmpi eq, %arg1, %c0_i32_18 : i32
      %33 = arith.extui %32 : i1 to i32
      %c0_i32_19 = arith.constant 0 : i32
      %34 = arith.cmpi ne, %33, %c0_i32_19 : i32
      scf.if %34 {
        %c0_20 = arith.constant 0 : index
        %c0_21 = arith.constant 0 : index
        %35 = vector.load %arg13[%c0_20, %c0_21] : memref<1x128xf32, #tpu.memory_space<vmem>>, vector<1x128xf32>
        %c0_22 = arith.constant 0 : index
        %c0_23 = arith.constant 0 : index
        %36 = vector.load %arg11[%c0_22, %c0_23] : memref<1x128xf32, #tpu.memory_space<vmem>>, vector<1x128xf32>
        %c0_24 = arith.constant 0 : index
        %c0_25 = arith.constant 0 : index
        %37 = vector.load %arg12[%c0_24, %c0_25] : memref<1x128xf32, #tpu.memory_space<vmem>>, vector<1x128xf32>
        %cst_26 = arith.constant 6.400000e+01 : f32
        %38 = vector.broadcast %cst_26 : f32 to vector<1x128xf32>
        %39 = arith.mulf %38, %35 : vector<1x128xf32>
        %40 = arith.addf %36, %39 : vector<1x128xf32>
        %c32_i32 = arith.constant 32 : i32
        %41 = tpu.dynamic_rotate %40 by %c32_i32 dim 1 : vector<1x128xf32>, i32 -> vector<1x128xf32>
        %42 = arith.addf %40, %41 : vector<1x128xf32>
        %c64_i32_27 = arith.constant 64 : i32
        %43 = tpu.dynamic_rotate %40 by %c64_i32_27 dim 1 : vector<1x128xf32>, i32 -> vector<1x128xf32>
        %44 = arith.addf %42, %43 : vector<1x128xf32>
        %c96_i32 = arith.constant 96 : i32
        %45 = tpu.dynamic_rotate %40 by %c96_i32 dim 1 : vector<1x128xf32>, i32 -> vector<1x128xf32>
        %46 = arith.addf %44, %45 : vector<1x128xf32>
        %cst_28 = arith.constant 2.560000e+02 : f32
        %47 = vector.broadcast %cst_28 : f32 to vector<1x128xf32>
        %48 = arith.divf %46, %47 : vector<1x128xf32>
        %49 = arith.subf %35, %48 : vector<1x128xf32>
        %cst_29 = arith.constant 2.000000e+00 : f32
        %50 = vector.broadcast %cst_29 : f32 to vector<1x128xf32>
        %51 = arith.mulf %50, %49 : vector<1x128xf32>
        %52 = arith.mulf %51, %36 : vector<1x128xf32>
        %53 = arith.addf %37, %52 : vector<1x128xf32>
        %cst_30 = arith.constant 6.400000e+01 : f32
        %54 = vector.broadcast %cst_30 : f32 to vector<1x128xf32>
        %55 = arith.mulf %54, %49 : vector<1x128xf32>
        %56 = arith.mulf %55, %49 : vector<1x128xf32>
        %57 = arith.addf %53, %56 : vector<1x128xf32>
        %c32_i32_31 = arith.constant 32 : i32
        %58 = tpu.dynamic_rotate %57 by %c32_i32_31 dim 1 : vector<1x128xf32>, i32 -> vector<1x128xf32>
        %59 = arith.addf %57, %58 : vector<1x128xf32>
        %c64_i32_32 = arith.constant 64 : i32
        %60 = tpu.dynamic_rotate %57 by %c64_i32_32 dim 1 : vector<1x128xf32>, i32 -> vector<1x128xf32>
        %61 = arith.addf %59, %60 : vector<1x128xf32>
        %c96_i32_33 = arith.constant 96 : i32
        %62 = tpu.dynamic_rotate %57 by %c96_i32_33 dim 1 : vector<1x128xf32>, i32 -> vector<1x128xf32>
        %63 = arith.addf %61, %62 : vector<1x128xf32>
        %cst_34 = arith.constant 2.560000e+02 : f32
        %cst_35 = arith.constant 1.000000e+00 : f32
        %64 = arith.subf %cst_34, %cst_35 : f32
        %65 = vector.broadcast %64 : f32 to vector<1x128xf32>
        %66 = arith.divf %63, %65 : vector<1x128xf32>
        %c0_36 = arith.constant 0 : index
        %c0_37 = arith.constant 0 : index
        %67 = vector.load %arg3[%c0_36, %c0_37] : memref<1x128xf32, #tpu.memory_space<vmem>>, vector<1x128xf32>
        %cst_38 = arith.constant 9.99999974E-6 : f32
        %68 = vector.broadcast %cst_38 : f32 to vector<1x128xf32>
        %69 = arith.addf %66, %68 : vector<1x128xf32>
        %70 = math.rsqrt %69 : vector<1x128xf32>
        %71 = math.exp %67 : vector<1x128xf32>
        %72 = arith.mulf %71, %70 : vector<1x128xf32>
        %c0_39 = arith.constant 0 : index
        %c0_40 = arith.constant 0 : index
        %73 = vector.load %arg14[%c0_39, %c0_40] : memref<1x128xf32, #tpu.memory_space<vmem>>, vector<1x128xf32>
        tpu.vector_store %arg14[%c0_39, %c0_40], %72 {strides = array<i32>} : memref<1x128xf32, #tpu.memory_space<vmem>>, vector<1x128xf32>,
        %c0_41 = arith.constant 0 : index
        %c0_42 = arith.constant 0 : index
        %74 = vector.load %arg4[%c0_41, %c0_42] : memref<1x128xf32, #tpu.memory_space<vmem>>, vector<1x128xf32>
        %75 = arith.mulf %48, %72 : vector<1x128xf32>
        %76 = arith.subf %74, %75 : vector<1x128xf32>
        %c0_43 = arith.constant 0 : index
        %c0_44 = arith.constant 0 : index
        %77 = vector.load %arg15[%c0_43, %c0_44] : memref<1x128xf32, #tpu.memory_space<vmem>>, vector<1x128xf32>
        tpu.vector_store %arg15[%c0_43, %c0_44], %76 {strides = array<i32>} : memref<1x128xf32, #tpu.memory_space<vmem>>, vector<1x128xf32>,
        %cst_45 = arith.constant 9.99999974E-6 : f32
        %78 = vector.broadcast %cst_45 : f32 to vector<1x128xf32>
        %79 = arith.addf %66, %78 : vector<1x128xf32>
        %80 = math.log %79 : vector<1x128xf32>
        %cst_46 = arith.constant 5.000000e-01 : f32
        %81 = vector.broadcast %cst_46 : f32 to vector<1x128xf32>
        %82 = arith.mulf %81, %80 : vector<1x128xf32>
        %83 = arith.subf %67, %82 : vector<1x128xf32>
        %c0_47 = arith.constant 0 : index
        %c0_48 = arith.constant 0 : index
        %84 = vector.load %arg8[%c0_47, %c0_48] : memref<1x128xf32, #tpu.memory_space<vmem>>, vector<1x128xf32>
        tpu.vector_store %arg8[%c0_47, %c0_48], %83 {strides = array<i32>} : memref<1x128xf32, #tpu.memory_space<vmem>>, vector<1x128xf32>,
        %c0_49 = arith.constant 0 : index
        %c0_50 = arith.constant 0 : index
        %85 = vector.load %arg5[%c0_49, %c0_50] : memref<1x128xf32, #tpu.memory_space<vmem>>, vector<1x128xf32>
        %cst_51 = arith.constant 0.899999976 : f32
        %86 = vector.broadcast %cst_51 : f32 to vector<1x128xf32>
        %87 = arith.mulf %86, %85 : vector<1x128xf32>
        %cst_52 = arith.constant 1.000000e-01 : f32
        %88 = vector.broadcast %cst_52 : f32 to vector<1x128xf32>
        %89 = arith.mulf %88, %48 : vector<1x128xf32>
        %90 = arith.addf %87, %89 : vector<1x128xf32>
        %c0_53 = arith.constant 0 : index
        %c0_54 = arith.constant 0 : index
        %91 = vector.load %arg9[%c0_53, %c0_54] : memref<1x128xf32, #tpu.memory_space<vmem>>, vector<1x128xf32>
        tpu.vector_store %arg9[%c0_53, %c0_54], %90 {strides = array<i32>} : memref<1x128xf32, #tpu.memory_space<vmem>>, vector<1x128xf32>,
        %c0_55 = arith.constant 0 : index
        %c0_56 = arith.constant 0 : index
        %92 = vector.load %arg6[%c0_55, %c0_56] : memref<1x128xf32, #tpu.memory_space<vmem>>, vector<1x128xf32>
        %cst_57 = arith.constant 0.899999976 : f32
        %93 = vector.broadcast %cst_57 : f32 to vector<1x128xf32>
        %94 = arith.mulf %93, %92 : vector<1x128xf32>
        %cst_58 = arith.constant 1.000000e-01 : f32
        %95 = vector.broadcast %cst_58 : f32 to vector<1x128xf32>
        %96 = arith.mulf %95, %66 : vector<1x128xf32>
        %97 = arith.addf %94, %96 : vector<1x128xf32>
        %c0_59 = arith.constant 0 : index
        %c0_60 = arith.constant 0 : index
        %98 = vector.load %arg10[%c0_59, %c0_60] : memref<1x128xf32, #tpu.memory_space<vmem>>, vector<1x128xf32>
        tpu.vector_store %arg10[%c0_59, %c0_60], %97 {strides = array<i32>} : memref<1x128xf32, #tpu.memory_space<vmem>>, vector<1x128xf32>,
      } else {
      }
    } else {
    }
    %c1_i32 = arith.constant 1 : i32
    %3 = arith.cmpi eq, %arg0, %c1_i32 : i32
    %4 = arith.extui %3 : i1 to i32
    %c0_i32_1 = arith.constant 0 : i32
    %5 = arith.cmpi ne, %4, %c0_i32_1 : i32
    scf.if %5 {
      %c0 = arith.constant 0 : index
      %c0_2 = arith.constant 0 : index
      %6 = vector.load %arg2[%c0, %c0_2] : memref<64x128xf32, #tpu.memory_space<vmem>>, vector<64x128xf32>
      %c0_3 = arith.constant 0 : index
      %c0_4 = arith.constant 0 : index
      %7 = vector.load %arg14[%c0_3, %c0_4] : memref<1x128xf32, #tpu.memory_space<vmem>>, vector<1x128xf32>
      %8 = vector.broadcast %7 : vector<1x128xf32> to vector<64x128xf32>
      %9 = arith.mulf %6, %8 : vector<64x128xf32>
      %c0_5 = arith.constant 0 : index
      %c0_6 = arith.constant 0 : index
      %10 = vector.load %arg15[%c0_5, %c0_6] : memref<1x128xf32, #tpu.memory_space<vmem>>, vector<1x128xf32>
      %11 = vector.broadcast %10 : vector<1x128xf32> to vector<64x128xf32>
      %12 = arith.addf %9, %11 : vector<64x128xf32>
      %c0_7 = arith.constant 0 : index
      %c0_8 = arith.constant 0 : index
      %13 = vector.load %arg7[%c0_7, %c0_8] : memref<64x128xf32, #tpu.memory_space<vmem>>, vector<64x128xf32>
      tpu.vector_store %arg7[%c0_7, %c0_8], %12 {strides = array<i32>} : memref<64x128xf32, #tpu.memory_space<vmem>>, vector<64x128xf32>,
    } else {
    }
    return
  }
  func.func @transform_0(%arg0: i32, %arg1: i32) -> (i32, i32) {
    %c0_i32 = arith.constant 0 : i32
    %c0_i32_0 = arith.constant 0 : i32
    return %arg1, %c0_i32 : i32, i32
  }
  func.func @transform_1(%arg0: i32, %arg1: i32) -> (i32, i32) {
    %c0_i32 = arith.constant 0 : i32
    %c0_i32_0 = arith.constant 0 : i32
    %c0_i32_1 = arith.constant 0 : i32
    return %c0_i32, %c0_i32_0 : i32, i32
  }
  func.func @transform_2(%arg0: i32, %arg1: i32) -> (i32, i32) {
    %c0_i32 = arith.constant 0 : i32
    %c0_i32_0 = arith.constant 0 : i32
    %c0_i32_1 = arith.constant 0 : i32
    return %c0_i32, %c0_i32_0 : i32, i32
  }
  func.func @transform_3(%arg0: i32, %arg1: i32) -> (i32, i32) {
    %c0_i32 = arith.constant 0 : i32
    %c0_i32_0 = arith.constant 0 : i32
    %c0_i32_1 = arith.constant 0 : i32
    return %c0_i32, %c0_i32_0 : i32, i32
  }
  func.func @transform_4(%arg0: i32, %arg1: i32) -> (i32, i32) {
    %c0_i32 = arith.constant 0 : i32
    %c0_i32_0 = arith.constant 0 : i32
    %c0_i32_1 = arith.constant 0 : i32
    return %c0_i32, %c0_i32_0 : i32, i32
  }
  func.func @transform_5(%arg0: i32, %arg1: i32) -> (i32, i32) {
    %0 = arith.muli %arg0, %arg1 : i32
    %c0_i32 = arith.constant 0 : i32
    %c0_i32_0 = arith.constant 0 : i32
    return %0, %c0_i32 : i32, i32
  }
  func.func @transform_6(%arg0: i32, %arg1: i32) -> (i32, i32) {
    %c0_i32 = arith.constant 0 : i32
    %c0_i32_0 = arith.constant 0 : i32
    %c0_i32_1 = arith.constant 0 : i32
    return %c0_i32, %c0_i32_0 : i32, i32
  }
  func.func @transform_7(%arg0: i32, %arg1: i32) -> (i32, i32) {
    %c0_i32 = arith.constant 0 : i32
    %c0_i32_0 = arith.constant 0 : i32
    %c0_i32_1 = arith.constant 0 : i32
    return %c0_i32, %c0_i32_0 : i32, i32
  }
  func.func @transform_8(%arg0: i32, %arg1: i32) -> (i32, i32) {
    %c0_i32 = arith.constant 0 : i32
    %c0_i32_0 = arith.constant 0 : i32
    %c0_i32_1 = arith.constant 0 : i32
    return %c0_i32, %c0_i32_0 : i32, i32
  }
}

</mosaic_0001>

<bundles_post_ra>
// kernel: tpu_custom_call.1
= control target key start
LH: loop header
LB: loop body
LE: loop exit
PB: predicated region body
PF: predicated region fallthrough
CT: control target
= control target key end

     0   :  { %14 = vsyncpa [#allocation8], 0  ;;  %s1208_s0 = inlined_call_operand.hbm [shape: f32[64,128], index: 0, kind: input, shape index: {}]   ;;  %s1209_s1 = inlined_call_operand.vmem [shape: f32[1,128], index: 1, kind: input, shape index: {}]   ;;  %s1210_s2 = inlined_call_operand.vmem [shape: f32[1,128], index: 2, kind: input, shape index: {}]   ;;  %s1211_s3 = inlined_call_operand.vmem [shape: f32[1,128], index: 3, kind: input, shape index: {}]   ;;  %s1212_s4 = inlined_call_operand.vmem [shape: f32[1,128], index: 4, kind: input, shape index: {}]   ;;  %s1213_s5 = inlined_call_operand.hbm [shape: f32[64,128], index: 5, kind: output, shape index: {0}]   ;;  %s1214_s6 = inlined_call_operand.hbm [shape: f32[1,128], index: 6, kind: output, shape index: {1}]   ;;  %s1215_s7 = inlined_call_operand.hbm [shape: f32[1,128], index: 7, kind: output, shape index: {2}]   ;;  %s1216_s8 = inlined_call_operand.hbm [shape: f32[1,128], index: 8, kind: output, shape index: {3}]  }
   0x1   :  { %15 = vsyncpa [#allocation9], 0 }
   0x2   :  { %17 = vsyncpa [#allocation9 + $0x1], 0 }
   0x3   :  { %18 = vsyncpa [#allocation12], 0 }
   0x4   :  { %19 = vsyncpa [#allocation15], 0  ;;  %s1026_s27 = smov 0   ;;  %s1028_s28 = smov 0  }
   0x5   :  { %s1030_s29 = smov 0  }
   0x6 LB: > { %s693_s30 = sadd.s32 4294967295, %s966_s29   ;;  %s694_s9 = sadd.s32 4294967294, %s966_s29   ;;  %s966_s29 = sphi %s1030_s29, %s25_s29   ;;  %s962_s28 = sphi %s1028_s28, %s1227_s28   ;;  %s958_s27 = sphi %s1026_s27, %s1226_s27  }
   0x7   : > { %s37_s10 = sadd.s32 1, %s962_s28  ;;  %p695_p0 = scmp.ge.s32.totalorder %s966_s29, 1 }
   0x8   : > { %p39_p1 = scmp.ge.s32.totalorder %s37_s10, 2  ;;  %p243_p2 = scmp.lt.s32.totalorder %s966_s29, 3 }
   0x9   : > { %p1048_p3 = scmp.eq.s32.totalorder %s693_s30, 0  ;;  %s968_s13 = smov [#allocation7]  }
   0xa   : > { %s1229_s10 = smov (%p39_p1, %s37_s10), 0  ;;  %p1054_p4 = pnand %p695_p0, %p243_p2 }
   0xb   : > { %s1220_s11 = scalar_select %p1048_p3, 1, 0 }
   0xc   : > { %s1221_s12 = scalar_select %p1054_p4, 1, 0 }
   0xd   : > { %s258_s14 = sshll.u32 %s968_s13, 4  ;;  %p734_p5 = pneg %p1054_p4  ;;  %s259_s14 = int_to_ptr.vmem [resolvable:$true] %s258_s14 }
   0xe   : > { %s796_s18 = scalar_lea.hbm %s1208_s0, 1024 }
   0xf   : > { %p1062_p6 = pnand %p1048_p3, %p734_p5  ;;  %p797_p7 = scmp.ne.s32.totalorder %s1208_s0, %s796_s18 }
  0x10   : > { %p803_p11 = scmp.lt.u32.totalorder %s796_s18, %s1208_s0 }
  0x11   : > { %p798_p8 = pneg %p1062_p6 }
  0x13   : > { %p799_p9 = pnand %p798_p8, %p797_p7 }
  0x15   : > { %p800_p10 = pneg %p799_p9 }
  0x17   : > { %p805_p12 = pnand %p803_p11, %p800_p10 }
  0x19   : > { %808 = shalt.err (!%p805_p12)
}
  0x1a   : > { %s809_s23 = scalar_lea.vmem %s259_s14, 1024  ;;  %p817_p2 = scmp.lt.s32.totalorder %s259_s14, %s259_s14 }
  0x1b   : > { %p810_p13 = scmp.ne.s32.totalorder %s259_s14, %s809_s23  ;;  %p818_p5 = scmp.lt.s32.totalorder %s809_s23, %s809_s23 }
  0x1d   : > { %p812_p0 = pnand %p810_p13, %p798_p8  ;;  %p819_p3 = por %p818_p5, %p817_p2 }
  0x1f   : > { %p813_p1 = pneg %p812_p0 }
  0x21   : > { %p820_p4 = pnand %p819_p3, %p813_p1 }
  0x23   : > { %823 = shalt.err (!%p820_p4)
}
  0x24   : > { %s969_s24 = smov 128   ;;  %s970_s25 = smov 8  }
  0x25   : > { %737 = dma.hbm_to_vmem [thread:$0]  (!%p1062_p6), %s1208_s0, 1024, %s259_s14, [#allocation8], %s969_s24, %s969_s24, %s970_s25  }
  0x26   : > { %p1223_p7 = scmp.ne.s32.totalorder %s1221_s12, 0 }
  0x27   : > { %p1224_p9 = scmp.ne.s32.totalorder (!%p1223_p7), %s1220_s11, 0 }
  0x28   : > { %286 = sbr.rel (%p1223_p7) target bundleno = 484 (0x1e4), region = 40 }
  0x2f   : > { %941 = dma.done.wait (%p1224_p9), [#allocation8], 1024  }
  0x30   : > { %943 = vsyncadd (%p1224_p9), [#allocation8], 4294966272  ;;  %p699_p3 = scmp.ne.s32.totalorder %s958_s27, 0 }
  0x31   : > { %v328_v0 = vld [vmem:[#allocation7] sm:$0x1] (!%p699_p3)  ;;  %v971_v1 = vmov (!%p699_p3), 0.0   ;;  %v331_v3 = vld [vmem:[#allocation7 + $0x8] sm:$0xff] (!%p699_p3)  ;;  %v332_v4 = vld [vmem:[#allocation7 + $0x10] sm:$0xff] (!%p699_p3)  ;;  %s972_s11 = smov (!%p699_p3), 32  }
  0x32   : > { %321 = sbr.rel (%p699_p3) target bundleno = 377 (0x179), region = 48  ;;  %326 = vst [vmem:[#allocation2] sm:$0x1] (!%p699_p3), %v971_v1  ;;  %329 = vst [vmem:[#allocation4] sm:$0x1] (!%p699_p3), %v328_v0  ;;  %v330_v2 = vld [vmem:[#allocation7] sm:$0xff] (!%p699_p3) }
  0x33   : > { %327 = vst [vmem:[#allocation3] sm:$0x1] (!%p699_p3), %v971_v1  ;;  %v333_v5 = vld [vmem:[#allocation7 + $0x18] sm:$0xff] (!%p699_p3)  ;;  %v334_v10 = vld [vmem:[#allocation7 + $0x20] sm:$0xff] (!%p699_p3)  ;;  %v335_v13 = vld [vmem:[#allocation7 + $0x28] sm:$0xff] (!%p699_p3)  ;;  %s973_s12 = smov (!%p699_p3), 96  }
  0x34   : > { %v336_v16 = vld [vmem:[#allocation7 + $0x30] sm:$0xff] (!%p699_p3)  ;;  %v337_v21 = vld [vmem:[#allocation7 + $0x38] sm:$0xff] (!%p699_p3)  ;;  %s974_s14 = smov (!%p699_p3), 64  }
  0x39   : > { %v700_v6 = vld [vmem:[#allocation4] ss:$0 sm:$0xff]  ;;  %v388_v48 = vld [vmem:[#allocation2] sm:$0x1] }
  0x3a   : > { %v372_v7 = vsub.f32 %v330_v2, %v700_v6  ;;  %v373_v8 = vsub.f32 %v331_v3, %v700_v6  ;;  %v374_v9 = vsub.f32 %v332_v4, %v700_v6  ;;  %v375_v11 = vsub.f32 %v333_v5, %v700_v6  ;;  %v431_v54 = vld [vmem:[#allocation4] sm:$0x1]  ;;  %v404_v56 = vld [vmem:[#allocation3] sm:$0x1]  ;;  %v481_v2 = vld [vmem:[%s1211_s3] sm:$0x1] }
  0x3b   : > { %v376_v14 = vsub.f32 %v334_v10, %v700_v6  ;;  %v377_v19 = vsub.f32 %v335_v13, %v700_v6  ;;  %v378_v24 = vsub.f32 %v336_v16, %v700_v6  ;;  %v379_v28 = vsub.f32 %v337_v21, %v700_v6  ;;  %v486_v21 = vld [vmem:[%s1212_s4] sm:$0x1] }
  0x3c   : > { %v389_v12 = vadd.f32 %v373_v8, %v372_v7  ;;  %v405_v17 = vmul.f32 %v372_v7, %v372_v7  ;;  %v406_v18 = vmul.f32 %v373_v8, %v373_v8  ;;  %v407_v22 = vmul.f32 %v374_v9, %v374_v9 }
  0x3d   : > { %v408_v26 = vmul.f32 %v375_v11, %v375_v11  ;;  %v409_v30 = vmul.f32 %v376_v14, %v376_v14  ;;  %v410_v33 = vmul.f32 %v377_v19, %v377_v19  ;;  %v411_v36 = vmul.f32 %v378_v24, %v378_v24 }
  0x3e   : > { %v390_v15 = vadd.f32 %v389_v12, %v374_v9  ;;  %v413_v23 = vadd.f32 %v406_v18, %v405_v17  ;;  %v412_v39 = vmul.f32 %v379_v28, %v379_v28  ;;  %v434_v58 = vmul.f32 64.0, %v431_v54 }
  0x3f   : > { %v482_v4 = vmul.f32 0.9, %v481_v2 }
  0x40   : > { %v391_v20 = vadd.f32 %v390_v15, %v375_v11  ;;  %v414_v27 = vadd.f32 %v413_v23, %v407_v22 }
  0x42   : > { %v392_v25 = vadd.f32 %v391_v20, %v376_v14  ;;  %v415_v31 = vadd.f32 %v414_v27, %v408_v26 }
  0x44   : > { %v393_v29 = vadd.f32 %v392_v25, %v377_v19  ;;  %v416_v34 = vadd.f32 %v415_v31, %v409_v30  ;;  %v465_v19 = vld [vmem:[%s1209_s1] sm:$0x1]  ;;  %v487_v25 = vmul.f32 0.9, %v486_v21 }
  0x45   : > { %v468_v23 = vmul.f32 1.442695, %v465_v19 }
  0x46   : > { %v394_v32 = vadd.f32 %v393_v29, %v378_v24  ;;  %v417_v37 = vadd.f32 %v416_v34, %v410_v33  ;;  %v472_v34 = vld [vmem:[%s1210_s2] sm:$0x1] }
  0x47   : > { %790 = vpow2.f32 %v468_v23 }
  0x48   : > { %v395_v35 = vadd.f32 %v394_v32, %v379_v28  ;;  %v418_v40 = vadd.f32 %v417_v37, %v411_v36 }
  0x4a   : > { %v396_v38 = vrot.slane %v395_v35, 4  ;;  %v419_v42 = vadd.f32 %v418_v40, %v412_v39 }
  0x4c   : > { %v397_v41 = vadd.f32 %v396_v38, %v395_v35  ;;  %v420_v44 = vrot.slane %v419_v42, 4 }
  0x4e   : > { %v398_v43 = vrot.slane %v397_v41, 2  ;;  %v421_v46 = vadd.f32 %v420_v44, %v419_v42 }
  0x50   : > { %v399_v45 = vadd.f32 %v398_v43, %v397_v41  ;;  %v422_v49 = vrot.slane %v421_v46, 2 }
  0x51   : > { %v791_v30 = vpop.eup %790 }
  0x52   : > { %v400_v47 = vrot.slane %v399_v45, 1  ;;  %v423_v51 = vadd.f32 %v422_v49, %v421_v46 }
  0x54   : > { %v401_v50 = vadd.f32 %v400_v47, %v399_v45  ;;  %v424_v53 = vrot.slane %v423_v51, 1 }
  0x56   : > { %v402_v52 = vadd.f32 %v401_v50, %v388_v48  ;;  %v425_v55 = vadd.f32 %v424_v53, %v423_v51 }
  0x58   : > { %403 = vst [vmem:[#allocation2] sm:$0x1] %v402_v52  ;;  %v426_v57 = vadd.f32 %v425_v55, %v404_v56 }
  0x5a   : > { %427 = vst [vmem:[#allocation3] sm:$0x1] %v426_v57 }
  0x5f   : > { %v432_v59 = vld [vmem:[#allocation2] sm:$0x1] }
  0x60   : > { %v435_v60 = vadd.f32 %v434_v58, %v432_v59 }
  0x61   : > { %v433_v11 = vld [vmem:[#allocation3] sm:$0x1] }
  0x62   : > { %436 = vrot.lane.b32.xlu0 %v435_v60, %s972_s11  ;;  %442 = vrot.lane.b32.xlu1 %v435_v60, %s973_s12 }
  0x66   : > { %439 = vrot.lane.b32.xlu0 %v435_v60, %s974_s14 }
  0xd4   : > { %v437_v61 = vpop.permute.xlu0 %436  ;;  %v443_v0 = vpop.permute.xlu1 %442 }
  0xd5   : > { %v438_v62 = vadd.f32 %v437_v61, %v435_v60 }
  0xd8   : > { %v440_v63 = vpop.permute.xlu0 %439 }
  0xd9   : > { %v441_v1 = vadd.f32 %v440_v63, %v438_v62 }
  0xdb   : > { %v444_v3 = vadd.f32 %v443_v0, %v441_v1 }
  0xdd   : > { %v446_v5 = vmul.f32 0.00390625, %v444_v3 }
  0xdf   : > { %v447_v6 = vsub.f32 %v431_v54, %v446_v5  ;;  %v483_v7 = vmul.f32 0.1, %v446_v5 }
  0xe1   : > { %v448_v8 = vmul.f32 2.0, %v447_v6  ;;  %v451_v9 = vmul.f32 64.0, %v447_v6  ;;  %v484_v10 = vadd.f32 %v483_v7, %v482_v4 }
  0xe3   : > { %485 = vst [vmem:[#allocation13] sm:$0x1] %v484_v10  ;;  %v449_v12 = vmul.f32 %v448_v8, %v432_v59  ;;  %v452_v14 = vmul.f32 %v451_v9, %v447_v6 }
  0xe5   : > { %v450_v13 = vadd.f32 %v449_v12, %v433_v11 }
  0xe7   : > { %v453_v15 = vadd.f32 %v452_v14, %v450_v13 }
  0xe9   : > { %457 = vrot.lane.b32.xlu0 %v453_v15, %s974_s14  ;;  %454 = vrot.lane.b32.xlu1 %v453_v15, %s972_s11 }
  0xed   : > { %460 = vrot.lane.b32.xlu1 %v453_v15, %s973_s12 }
 0x15b   : > { %v455_v16 = vpop.permute.xlu1 %454  ;;  %v458_v18 = vpop.permute.xlu0 %457 }
 0x15c   : > { %v456_v17 = vadd.f32 %v455_v16, %v453_v15 }
 0x15e   : > { %v459_v20 = vadd.f32 %v458_v18, %v456_v17 }
 0x15f   : > { %v461_v22 = vpop.permute.xlu1 %460 }
 0x160   : > { %v462_v24 = vadd.f32 %v461_v22, %v459_v20 }
 0x162   : > { %v464_v26 = vmul.f32 0.003921569, %v462_v24 }
 0x164   : > { %v466_v27 = vadd.f32 1e-05, %v464_v26  ;;  %v488_v28 = vmul.f32 0.1, %v464_v26 }
 0x166   : > { %792 = vrsqrt.f32 %v466_v27  ;;  %v489_v29 = vadd.f32 %v488_v28, %v487_v25 }
 0x167   : > { %794 = vlog2.f32 %v466_v27 }
 0x168   : > { %490 = vst [vmem:[#allocation14] sm:$0x1] %v489_v29 }
 0x170   : > { %v793_v31 = vpop.eup %792 }
 0x171   : > { %v795_v32 = vpop.eup %794  ;;  %v470_v33 = vmul.f32 %v793_v31, %v791_v30 }
 0x172   : > { %v477_v35 = vmul.f32 0.6931472, %v795_v32 }
 0x173   : > { %471 = vst [vmem:[#allocation5] sm:$0x1] %v470_v33  ;;  %v473_v36 = vmul.f32 %v470_v33, %v446_v5 }
 0x174   : > { %v478_v37 = vmul.f32 0.5, %v477_v35 }
 0x175   : > { %v474_v38 = vsub.f32 %v472_v34, %v473_v36 }
 0x176   : > { %v479_v39 = vsub.f32 %v465_v19, %v478_v37 }
 0x177   : > { %475 = vst [vmem:[#allocation6] sm:$0x1] %v474_v38 }
 0x178   : > { %480 = vst [vmem:[#allocation11] sm:$0x1] %v479_v39 }
 0x179 PF: > { %p701_p4 = scmp.ne.s32.totalorder %s958_s27, 1 }
 0x17a   : > { %v495_v40 = vld [vmem:[#allocation7] sm:$0xff] (!%p701_p4)  ;;  %v702_v41 = vld [vmem:[#allocation5] ss:$0 sm:$0xff] (!%p701_p4)  ;;  %v496_v44 = vld [vmem:[#allocation7 + $0x8] sm:$0xff] (!%p701_p4) }
 0x17b   : > { %494 = sbr.rel (%p701_p4) target bundleno = 389 (0x185), region = 60  ;;  %v510_v43 = vmul.f32 (!%p701_p4), %v702_v41, %v495_v40  ;;  %v497_v45 = vld [vmem:[#allocation7 + $0x10] sm:$0xff] (!%p701_p4)  ;;  %v498_v46 = vld [vmem:[#allocation7 + $0x18] sm:$0xff] (!%p701_p4)  ;;  %v511_v47 = vmul.f32 (!%p701_p4), %v702_v41, %v496_v44  ;;  %v499_v50 = vld [vmem:[#allocation7 + $0x20] sm:$0xff] (!%p701_p4) }
 0x17c   : > { %v512_v48 = vmul.f32 (!%p701_p4), %v702_v41, %v497_v45  ;;  %v513_v49 = vmul.f32 (!%p701_p4), %v702_v41, %v498_v46  ;;  %v500_v51 = vld [vmem:[#allocation7 + $0x28] sm:$0xff] (!%p701_p4)  ;;  %v501_v52 = vld [vmem:[#allocation7 + $0x30] sm:$0xff] (!%p701_p4)  ;;  %v514_v54 = vmul.f32 (!%p701_p4), %v702_v41, %v499_v50  ;;  %v502_v57 = vld [vmem:[#allocation7 + $0x38] sm:$0xff] (!%p701_p4) }
 0x17d   : > { %v515_v55 = vmul.f32 (!%p701_p4), %v702_v41, %v500_v51  ;;  %v516_v56 = vmul.f32 (!%p701_p4), %v702_v41, %v501_v52  ;;  %v517_v61 = vmul.f32 (!%p701_p4), %v702_v41, %v502_v57 }
 0x17e   : > { %v703_v42 = vld [vmem:[#allocation6] ss:$0 sm:$0xff] (!%p701_p4) }
 0x17f   : > { %v525_v53 = vadd.f32 (!%p701_p4), %v703_v42, %v510_v43  ;;  %v526_v58 = vadd.f32 (!%p701_p4), %v703_v42, %v511_v47  ;;  %v527_v59 = vadd.f32 (!%p701_p4), %v703_v42, %v512_v48  ;;  %v528_v60 = vadd.f32 (!%p701_p4), %v703_v42, %v513_v49 }
 0x180   : > { %v529_v62 = vadd.f32 (!%p701_p4), %v703_v42, %v514_v54  ;;  %v530_v63 = vadd.f32 (!%p701_p4), %v703_v42, %v515_v55  ;;  %v531_v0 = vadd.f32 (!%p701_p4), %v703_v42, %v516_v56  ;;  %v532_v1 = vadd.f32 (!%p701_p4), %v703_v42, %v517_v61 }
 0x181   : > { %533 = vst [vmem:[#allocation10] sm:$0xff] (!%p701_p4), %v525_v53  ;;  %534 = vst [vmem:[#allocation10 + $0x8] sm:$0xff] (!%p701_p4), %v526_v58 }
 0x182   : > { %535 = vst [vmem:[#allocation10 + $0x10] sm:$0xff] %v527_v59  ;;  %536 = vst [vmem:[#allocation10 + $0x18] sm:$0xff] %v528_v60 }
 0x183   : > { %537 = vst [vmem:[#allocation10 + $0x20] sm:$0xff] %v529_v62  ;;  %538 = vst [vmem:[#allocation10 + $0x28] sm:$0xff] %v530_v63 }
 0x184   : > { %539 = vst [vmem:[#allocation10 + $0x30] sm:$0xff] %v531_v0  ;;  %540 = vst [vmem:[#allocation10 + $0x38] sm:$0xff] %v532_v1 }
 0x185 PF: > { %p1104_p6 = scmp.eq.s32.totalorder %s693_s30, 1  ;;  %s975_s23 = smov [#allocation11]  }
 0x186   : > { %s570_s24 = sshll.u32 %s975_s23, 4  ;;  %s571_s24 = int_to_ptr.vmem [resolvable:$true] %s570_s24 }
 0x187   : > { %s824_s25 = scalar_lea.vmem %s571_s24, 16  ;;  %s830_s26 = scalar_lea.vmem %s571_s24, 32 }
 0x188   : > { %p825_p8 = scmp.ne.s32.totalorder %s571_s24, %s824_s25  ;;  %p831_p12 = scmp.lt.s32.totalorder %s571_s24, %s571_s24 }
 0x189   : > { %p832_p13 = scmp.lt.s32.totalorder %s830_s26, %s824_s25 }
 0x18a   : > { %p826_p10 = pnand %p825_p8, %p1104_p6 }
 0x18b   : > { %p833_p0 = por %p832_p13, %p831_p12 }
 0x18c   : > { %p827_p11 = pneg %p826_p10 }
 0x18e   : > { %p834_p1 = pnand %p833_p0, %p827_p11 }
 0x190   : > { %837 = shalt.err (!%p834_p1)
}
 0x191   : > { %s838_s11 = scalar_lea.hbm %s1214_s6, 16 }
 0x192   : > { %p839_p2 = scmp.ne.s32.totalorder %s1214_s6, %s838_s11  ;;  %p844_p9 = scmp.lt.u32.totalorder %s838_s11, %s1214_s6 }
 0x194   : > { %p840_p5 = pnand %p839_p2, %p1104_p6 }
 0x196   : > { %p841_p7 = pneg %p840_p5 }
 0x198   : > { %p846_p3 = pnand %p844_p9, %p841_p7 }
 0x19a   : > { %849 = shalt.err (!%p846_p3)
}
 0x19b   : > { %721 = dma.vmem_to_hbm [thread:$0]  (%p1104_p6), %s571_s24, 16, %s1214_s6, [#allocation12]  }
 0x19c   : > { %s976_s19 = smov [#allocation10]  }
 0x19d   : > { %s556_s20 = sshll.u32 %s976_s19, 4  ;;  %s557_s20 = int_to_ptr.vmem [resolvable:$true] %s556_s20 }
 0x19e   : > { %s850_s21 = scalar_lea.vmem %s557_s20, 1024  ;;  %s856_s22 = scalar_lea.vmem %s557_s20, 2048 }
 0x19f   : > { %p851_p4 = scmp.ne.s32.totalorder %s557_s20, %s850_s21  ;;  %p857_p11 = scmp.lt.s32.totalorder %s557_s20, %s557_s20 }
 0x1a0   : > { %p858_p12 = scmp.lt.s32.totalorder %s856_s22, %s850_s21 }
 0x1a1   : > { %p852_p8 = pnand %p851_p4, %p1104_p6 }
 0x1a2   : > { %p859_p13 = por %p858_p12, %p857_p11 }
 0x1a3   : > { %p853_p10 = pneg %p852_p8 }
 0x1a5   : > { %p860_p0 = pnand %p859_p13, %p853_p10 }
 0x1a7   : > { %863 = shalt.err (!%p860_p0)
}
 0x1a8   : > { %s864_s26 = scalar_lea.hbm %s1213_s5, 1024 }
 0x1a9   : > { %p865_p1 = scmp.ne.s32.totalorder %s1213_s5, %s864_s26  ;;  %p870_p7 = scmp.lt.u32.totalorder %s864_s26, %s1213_s5 }
 0x1ab   : > { %p866_p2 = pnand %p865_p1, %p1104_p6 }
 0x1ad   : > { %p867_p5 = pneg %p866_p2 }
 0x1af   : > { %p872_p9 = pnand %p870_p7, %p867_p5 }
 0x1b1   : > { %875 = shalt.err (!%p872_p9)
}
 0x1b2   : > { %s977_s12 = smov 128   ;;  %s978_s14 = smov 8  }
 0x1b3   : > { %719 = dma.vmem_to_hbm [thread:$0]  (%p1104_p6), %s557_s20, 1024, %s1213_s5, [#allocation9], %s977_s12, %s977_s12, %s978_s14  }
 0x1b4   : > { %s979_s17 = smov [#allocation13]   ;;  %s980_s19 = smov [#allocation14]  }
 0x1b5   : > { %s581_s18 = sshll.u32 %s979_s17, 4  ;;  %s592_s21 = sshll.u32 %s980_s19, 4  ;;  %s582_s18 = int_to_ptr.vmem [resolvable:$true] %s581_s18  ;;  %s1144_s21 = int_to_ptr.vmem [resolvable:$true] %s592_s21 }
 0x1b6   : > { %s876_s22 = scalar_lea.vmem %s582_s18, 16  ;;  %s882_s23 = scalar_lea.vmem %s582_s18, 32 }
 0x1b7   : > { %p877_p3 = scmp.ne.s32.totalorder %s582_s18, %s876_s22  ;;  %p883_p10 = scmp.lt.s32.totalorder %s582_s18, %s582_s18 }
 0x1b8   : > { %p884_p11 = scmp.lt.s32.totalorder %s882_s23, %s876_s22 }
 0x1b9   : > { %p878_p4 = pnand %p877_p3, %p1104_p6 }
 0x1ba   : > { %p885_p12 = por %p884_p11, %p883_p10 }
 0x1bb   : > { %p879_p8 = pneg %p878_p4 }
 0x1bd   : > { %p886_p13 = pnand %p885_p12, %p879_p8 }
 0x1bf   : > { %889 = shalt.err (!%p886_p13)
}
 0x1c0   : > { %s890_s26 = scalar_lea.hbm %s1215_s7, 16 }
 0x1c1   : > { %p891_p0 = scmp.ne.s32.totalorder %s1215_s7, %s890_s26  ;;  %p896_p5 = scmp.lt.u32.totalorder %s890_s26, %s1215_s7 }
 0x1c3   : > { %p892_p1 = pnand %p891_p0, %p1104_p6 }
 0x1c5   : > { %p893_p2 = pneg %p892_p1 }
 0x1c7   : > { %p898_p7 = pnand %p896_p5, %p893_p2 }
 0x1c9   : > { %901 = shalt.err (!%p898_p7)
}
 0x1ca   : > { %723 = dma.vmem_to_hbm [thread:$0]  (%p1104_p6), %s582_s18, 16, %s1215_s7, [#allocation12]  }
 0x1cb   : > { %s902_s15 = scalar_lea.vmem %s1144_s21, 16  ;;  %s908_s16 = scalar_lea.vmem %s1144_s21, 32 }
 0x1cc   : > { %p903_p9 = scmp.ne.s32.totalorder %s1144_s21, %s902_s15  ;;  %p909_p8 = scmp.lt.s32.totalorder %s1144_s21, %s1144_s21 }
 0x1cd   : > { %p910_p10 = scmp.lt.s32.totalorder %s908_s16, %s902_s15 }
 0x1ce   : > { %p904_p3 = pnand %p903_p9, %p1104_p6 }
 0x1cf   : > { %p911_p11 = por %p910_p10, %p909_p8 }
 0x1d0   : > { %p905_p4 = pneg %p904_p3 }
 0x1d2   : > { %p912_p12 = pnand %p911_p11, %p905_p4 }
 0x1d4   : > { %915 = shalt.err (!%p912_p12)
}
 0x1d5   : > { %s916_s22 = scalar_lea.hbm %s1216_s8, 16 }
 0x1d6   : > { %p917_p13 = scmp.ne.s32.totalorder %s1216_s8, %s916_s22  ;;  %p922_p2 = scmp.lt.u32.totalorder %s916_s22, %s1216_s8 }
 0x1d8   : > { %p918_p0 = pnand %p917_p13, %p1104_p6 }
 0x1da   : > { %p919_p1 = pneg %p918_p0 }
 0x1dc   : > { %p924_p5 = pnand %p922_p2, %p919_p1 }
 0x1de   : > { %927 = shalt.err (!%p924_p5)
}
 0x1df   : > { %725 = dma.vmem_to_hbm [thread:$0]  (%p1104_p6), %s1144_s21, 16, %s1216_s8, [#allocation15]  }
 0x1e0   : > { %945 = dma.done.wait (%p1104_p6), [#allocation12], 32  }
 0x1e1   : > { %947 = vsyncadd (%p1104_p6), [#allocation12], 4294967264 }
 0x1e2   : > { %949 = dma.done.wait (%p1104_p6), [#allocation15], 16  }
 0x1e3   : > { %951 = vsyncadd (%p1104_p6), [#allocation15], 4294967280 }
 0x1e4 PF: > { %p751_p7 = scmp.ge.s32.totalorder %s966_s29, 2  ;;  %p752_p9 = scmp.eq.s32.totalorder %s694_s9, 1 }
 0x1e6   : > { %p739_p3 = pnand %p752_p9, %p751_p7 }
 0x1e8   : > { %953 = dma.done.wait (!%p739_p3), [#allocation9], 1024  }
 0x1e9   : > { %955 = vsyncadd (!%p739_p3), [#allocation9], 4294966272  ;;  %s25_s29 = sadd.s32 1, %s966_s29   ;;  %s1226_s27 = smov %s962_s28 }
 0x1ea   : > { %p22_p4 = scmp.ge.s32.totalorder %s25_s29, 4   ;;  %s1227_s28 = smov %s1229_s10 }
 0x1ec   :  { %24 = sbr.rel (!%p22_p4) target bundleno = 6 (0x6), region = 118 }
 0x1f3   :  { %622 = vsyncpa [#allocation8], 1 }
 0x1f4   :  { %624 = vsyncpa [#allocation8 + $0x1], 1 }
 0x1f5   :  { %625 = vsyncpa [#allocation9], 1 }
 0x1f6   :  { %627 = vsyncpa [#allocation9 + $0x1], 1 }
 0x1f7   :  { %628 = vsyncpa [#allocation12], 1 }
 0x1f8   :  { %629 = vsyncpa [#allocation15], 1 }

</bundles_post_ra>
